<compile_context>
chip_gen: v7x
topology: tpu7x:2x2x1
jax: 0.10.0
libtpu: 0.0.40
codegen_flags: <defaults>
</compile_context>

<pallas_src>
import functools

import jax
import jax.numpy as jnp
from jax.experimental import pallas as pl
from jax.experimental.pallas import tpu as pltpu


def _rmsnorm_kernel(x_ref, w_ref, o_ref, *, eps, inv_hidden, input_dtype):
    # Pass 1: square + reduce.  Only the (tr, 1) statistic must survive the
    # reduction; the f32 upcast of the tile is consumed immediately and is NOT
    # kept live (we re-read the tile below), avoiding un-budgeted VMEM scratch.
    x32 = x_ref[...].astype(jnp.float32)
    ssq = jnp.sum(x32 * x32, axis=-1, keepdims=True)
    inv = jax.lax.rsqrt(ssq * inv_hidden + eps)   # 1/hidden folded in (static)

    # Pass 2: re-read from VMEM (vld is cheap; kernel is HBM-bound), normalize,
    # cast back to the input dtype (PyTorch), multiply by weight, cast to out.
    normed = (x_ref[...].astype(jnp.float32) * inv).astype(input_dtype)
    o_ref[...] = (w_ref[...] * normed).astype(o_ref.dtype)


def _sublane_pack(dtype) -> int:
    """Sublane packing factor: 8 rows/vreg for 4-byte, 16 for 2-byte, 32 for 1-byte."""
    return {4: 8, 2: 16, 1: 32}.get(jnp.dtype(dtype).itemsize, 8)


def _round_up(n: int, m: int) -> int:
    return ((n + m - 1) // m) * m


def _device_info():
    """(is_v7x, scoped vmem_limit_bytes) with explicit per-generation clamps."""
    kind = ""
    try:
        kind = jax.devices()[0].device_kind.lower()
    except Exception:  # pragma: no cover
        pass
    is_v7x = "v7" in kind
    if is_v7x:
        # 64 MiB physical VMEM per TensorCore on v7x.  Clamp explicitly to
        # 48 MiB (headroom for compiler scratch) regardless of whether the
        # capacity query reports per-chip (128 MiB) or per-core numbers.
        return True, 48 << 20
    cap = 128 << 20  # v5e/v6e physical per TC
    try:
        cap = int(pltpu.get_tpu_info().vmem_capacity_bytes)
    except Exception:  # pragma: no cover
        pass
    return False, max(16 << 20, min(cap // 2, 64 << 20))


def llama_rms_norm(x, weight, eps=1e-6, *, out_dtype=None, max_row_block=512):
    """x: (..., hidden).  weight: (hidden,) float32 (PyTorch default).

    out_dtype=None follows PyTorch promotion (f32 weight * bf16 act -> f32 out).
    Pass out_dtype=x.dtype in production with bf16 activations to cut HBM write
    traffic in half (~1.5x speedup at the HBM roofline on every generation).
    """
    orig_shape = x.shape
    hidden = orig_shape[-1]
    rows = 1
    for d in orig_shape[:-1]:
        rows *= d

    x2d = x.reshape(rows, hidden)
    w2d = weight.reshape(1, hidden)

    if out_dtype is None:
        out_dtype = jnp.promote_types(weight.dtype, x.dtype)

    is_v7x, vmem_limit = _device_info()

    in_bytes = jnp.dtype(x.dtype).itemsize
    out_bytes = jnp.dtype(out_dtype).itemsize
    w_bytes = jnp.dtype(weight.dtype).itemsize
    # Align the row tile to the packing factor of the narrowest dtype in play
    # so neither the packed load nor the packed store produces masked sublanes.
    pack = max(_sublane_pack(x.dtype), _sublane_pack(out_dtype))

    # Budget: double-buffered input + output tiles, ~2 f32 row-intermediates of
    # compute scratch, resident weight block, and 4 MiB compiler headroom.
    tile_budget = max(vmem_limit - 2 * hidden * w_bytes - (4 << 20), 1 << 20)
    per_row = 2 * hidden * (in_bytes + out_bytes) + 8 * hidden
    tr = max(tile_budget // per_row, pack)
    tr = min(tr, max_row_block, _round_up(rows, pack))
    tr = max((tr // pack) * pack, pack)

    # v7x: two TensorCores split the "parallel" grid axis; make sure there are
    # enough grid steps for both cores to stay busy and for the double-buffer
    # pipeline to overlap.  v5e/v6e (single TC) are left with the big tiles.
    if is_v7x:
        min_steps = 8
        if rows >= min_steps * pack:
            cap = ((rows // min_steps) // pack) * pack
            tr = max(min(tr, cap), pack)

    # cdiv grid: no divisor search; the ragged last block (if any) is padded on
    # load and masked on store, and rows are independent, so it stays correct.
    grid = (pl.cdiv(rows, tr),)

    kernel = functools.partial(
        _rmsnorm_kernel, eps=eps, inv_hidden=1.0 / hidden, input_dtype=x.dtype
    )

    # Advisory cost: tells XLA this op is pure bandwidth so neighbors overlap.
    cost = pl.CostEstimate(
        flops=3 * rows * hidden,
        transcendentals=rows,
        bytes_accessed=rows * hidden * (in_bytes + out_bytes) + hidden * w_bytes,
    )

    out2d = pl.pallas_call(
        kernel,
        out_shape=jax.ShapeDtypeStruct((rows, hidden), out_dtype),
        grid_spec=pltpu.PrefetchScalarGridSpec(
            num_scalar_prefetch=0,
            grid=grid,
            in_specs=[
                pl.BlockSpec((tr, hidden), lambda i: (i, 0)),
                # Constant index_map -> weight block stays resident (one DMA).
                pl.BlockSpec((1, hidden), lambda i: (0, 0)),
            ],
            out_specs=pl.BlockSpec((tr, hidden), lambda i: (i, 0)),
        ),
        compiler_params=pltpu.CompilerParams(
            dimension_semantics=("parallel",),   # lets v7x's 2 TCs split rows
            vmem_limit_bytes=int(vmem_limit),
        ),
        cost_estimate=cost,
    )(x2d, w2d)

    return out2d.reshape(orig_shape)


def llama_rms_norm_ref(x, weight, eps=1e-6):
    x32 = x.astype(jnp.float32)
    variance = jnp.mean(x32 * x32, axis=-1, keepdims=True)
    normed = (x32 * jax.lax.rsqrt(variance + eps)).astype(x.dtype)
    return weight * normed


if __name__ == "__main__":
    batch, seq, hidden = 2, 8, 32
    key = jax.random.PRNGKey(0)
    x = jax.random.normal(key, (batch, seq, hidden), dtype=jnp.float32)

    # Deterministic parameter init (matches nn.Parameter(torch.ones(hidden_size))).
    weight = jnp.ones((hidden,), dtype=jnp.float32)
    eps = 1e-6

    out = llama_rms_norm(x, weight, eps)
    out = jax.block_until_ready(out)

    ref = llama_rms_norm_ref(x, weight, eps)
    assert out.shape == x.shape, (out.shape, x.shape)
    assert out.dtype == jnp.promote_types(weight.dtype, x.dtype)
    assert jnp.allclose(out, ref, atol=1e-5, rtol=1e-5), "mismatch vs reference"

    print("KERNEL_OK")
</pallas_src>

<mosaic_0001>
module attributes {stable_mosaic.version = 11 : i64} {
  func.func @_rmsnorm_kernel(%arg0: i32, %arg1: memref<16x32xf32, #tpu.memory_space<vmem>>, %arg2: memref<1x32xf32, #tpu.memory_space<vmem>>, %arg3: memref<16x32xf32, #tpu.memory_space<vmem>>) attributes {dimension_semantics = [#tpu.dimension_semantics<parallel>], iteration_bounds = array<i64: 1>, scalar_prefetch = 0 : i64, scratch_operands = 0 : i64, tpu.core_type = #tpu.core_type<tc>, window_params = [{transform_indices = @transform_0, window_bounds = array<i64: 16, 32>}, {pipeline_mode = #tpu.pipeline_mode<synchronous>, transform_indices = @transform_1, window_bounds = array<i64: 1, 32>}, {transform_indices = @transform_2, window_bounds = array<i64: 16, 32>}]} {
    %c0 = arith.constant 0 : index
    %c0_0 = arith.constant 0 : index
    %0 = vector.load %arg1[%c0, %c0_0] : memref<16x32xf32, #tpu.memory_space<vmem>>, vector<16x32xf32>
    %1 = arith.mulf %0, %0 : vector<16x32xf32>
    %cst = arith.constant dense<0.000000e+00> : vector<16xf32>
    %2 = vector.multi_reduction <add>, %1, %cst [1] : vector<16x32xf32> to vector<16xf32>
    %3 = vector.shape_cast %2 : vector<16xf32> to vector<16x1xf32>
    %cst_1 = arith.constant 3.125000e-02 : f32
    %4 = vector.broadcast %cst_1 : f32 to vector<16x1xf32>
    %5 = arith.mulf %3, %4 : vector<16x1xf32>
    %cst_2 = arith.constant 9.99999997E-7 : f32
    %6 = vector.broadcast %cst_2 : f32 to vector<16x1xf32>
    %7 = arith.addf %5, %6 : vector<16x1xf32>
    %8 = math.rsqrt %7 : vector<16x1xf32>
    %c0_3 = arith.constant 0 : index
    %c0_4 = arith.constant 0 : index
    %9 = vector.load %arg1[%c0_3, %c0_4] : memref<16x32xf32, #tpu.memory_space<vmem>>, vector<16x32xf32>
    %10 = vector.broadcast %8 : vector<16x1xf32> to vector<16x32xf32>
    %11 = arith.mulf %9, %10 : vector<16x32xf32>
    %c0_5 = arith.constant 0 : index
    %c0_6 = arith.constant 0 : index
    %12 = vector.load %arg2[%c0_5, %c0_6] : memref<1x32xf32, #tpu.memory_space<vmem>>, vector<1x32xf32>
    %13 = vector.broadcast %12 : vector<1x32xf32> to vector<16x32xf32>
    %14 = arith.mulf %13, %11 : vector<16x32xf32>
    %c0_7 = arith.constant 0 : index
    %c0_8 = arith.constant 0 : index
    %15 = vector.load %arg3[%c0_7, %c0_8] : memref<16x32xf32, #tpu.memory_space<vmem>>, vector<16x32xf32>
    tpu.vector_store %arg3[%c0_7, %c0_8], %14 {strides = array<i32>} : memref<16x32xf32, #tpu.memory_space<vmem>>, vector<16x32xf32>,
    return
  }
  func.func @transform_0(%arg0: i32) -> (i32, i32) {
    %c0_i32 = arith.constant 0 : i32
    %c0_i32_0 = arith.constant 0 : i32
    return %arg0, %c0_i32 : i32, i32
  }
  func.func @transform_1(%arg0: i32) -> (i32, i32) {
    %c0_i32 = arith.constant 0 : i32
    %c0_i32_0 = arith.constant 0 : i32
    %c0_i32_1 = arith.constant 0 : i32
    return %c0_i32, %c0_i32_0 : i32, i32
  }
  func.func @transform_2(%arg0: i32) -> (i32, i32) {
    %c0_i32 = arith.constant 0 : i32
    %c0_i32_0 = arith.constant 0 : i32
    return %arg0, %c0_i32 : i32, i32
  }
}

</mosaic_0001>

<bundles_post_ra>
// kernel: tpu_custom_call.1
= control target key start
LH: loop header
LB: loop body
LE: loop exit
PB: predicated region body
PF: predicated region fallthrough
CT: control target
= control target key end

     0   :  { %7 = vsyncpa [#allocation3], 0  ;;  %s234_s0 = inlined_call_operand.hbm [shape: f32[16,32], index: 0, kind: input, shape index: {}]   ;;  %s235_s1 = inlined_call_operand.hbm [shape: f32[1,32], index: 1, kind: input, shape index: {}]   ;;  %s236_s2 = inlined_call_operand.hbm [shape: f32[16,32], index: 2, kind: output, shape index: {}]  }
   0x1   :  { %8 = vsyncpa [#allocation6], 0 }
   0x2   :  { %9 = vsyncpa [#allocation4], 0  ;;  %s168_s9 = smov [#allocation2]   ;;  %s96_s13 = scalar_lea.hbm %s234_s0, 256 }
   0x3   :  { %s15_s10 = sshll.u32 %s168_s9, 4  ;;  %p97_p0 = scmp.ne.s32.totalorder %s234_s0, %s96_s13  ;;  %s16_s10 = int_to_ptr.vmem [resolvable:$true] %s15_s10 }
   0x4   :  { %p100_p1 = scmp.lt.u32.totalorder %s96_s13, %s234_s0 }
   0x6   :  { %p102_p2 = pnand %p100_p1, %p97_p0 }
   0x8   :  { %105 = shalt.err (!%p102_p2)
}
   0x9   :  { %s106_s18 = scalar_lea.vmem %s16_s10, 256  ;;  %p111_p4 = scmp.lt.s32.totalorder %s16_s10, %s16_s10 }
   0xa   :  { %p107_p3 = scmp.ne.s32.totalorder %s16_s10, %s106_s18  ;;  %p112_p5 = scmp.lt.s32.totalorder %s106_s18, %s106_s18 }
   0xc   :  { %p113_p6 = por %p112_p5, %p111_p4 }
   0xe   :  { %p114_p7 = pnand %p113_p6, %p107_p3 }
  0x10   :  { %117 = shalt.err (!%p114_p7)
}
  0x11   :  { %s169_s19 = smov 128   ;;  %s170_s20 = smov 8  }
  0x12   :  { %21 = dma.hbm_to_vmem [thread:$0]  %s234_s0, 256, %s16_s10, [#allocation3], %s169_s19, %s169_s19, %s170_s20  }
  0x13   :  { %s171_s23 = smov [#allocation5]   ;;  %s118_s27 = scalar_lea.hbm %s235_s1, 16 }
  0x14   :  { %s28_s24 = sshll.u32 %s171_s23, 4  ;;  %p119_p8 = scmp.ne.s32.totalorder %s235_s1, %s118_s27  ;;  %s29_s24 = int_to_ptr.vmem [resolvable:$true] %s28_s24 }
  0x15   :  { %p122_p9 = scmp.lt.u32.totalorder %s118_s27, %s235_s1 }
  0x17   :  { %p124_p10 = pnand %p122_p9, %p119_p8 }
  0x19   :  { %127 = shalt.err (!%p124_p10)
}
  0x1a   :  { %s128_s4 = scalar_lea.vmem %s29_s24, 16  ;;  %s132_s0 = scalar_lea.vmem %s29_s24, 32 }
  0x1b   :  { %p129_p11 = scmp.ne.s32.totalorder %s29_s24, %s128_s4  ;;  %p133_p12 = scmp.lt.s32.totalorder %s29_s24, %s29_s24 }
  0x1c   :  { %p134_p13 = scmp.lt.s32.totalorder %s132_s0, %s128_s4 }
  0x1e   :  { %p135_p0 = por %p134_p13, %p133_p12 }
  0x20   :  { %p136_p1 = pnand %p135_p0, %p129_p11 }
  0x22   :  { %139 = shalt.err (!%p136_p1)
}
  0x23   :  { %31 = dma.hbm_to_vmem [thread:$0]  %s235_s1, 16, %s29_s24, [#allocation6]  }
  0x24   :  { %162 = dma.done.wait [#allocation3], 256  }
  0x25   :  { %163 = vsyncadd [#allocation3], 4294967040 }
  0x26   :  { %164 = dma.done.wait [#allocation6], 16  }
  0x27   :  { %165 = vsyncadd [#allocation6], 4294967280  ;;  %v38_v0 = vld [vmem:[#allocation2] sm:$0xff]  ;;  %vm42_vm0 = vcmask 261120   ;;  %v39_v1 = vld [vmem:[#allocation2 + $0x8] sm:$0xff]  ;;  %s172_s1 = smov [#allocation7]  }
  0x28   :  { %v40_v2 = vmul.f32 %v38_v0, %v38_v0  ;;  %v41_v3 = vmul.f32 %v39_v1, %v39_v1  ;;  %v86_v13 = vld [vmem:[#allocation5] ss:$0 sm:$0xff]  ;;  %s73_s7 = sshll.u32 %s172_s1, 4  ;;  %s74_s7 = int_to_ptr.vmem [resolvable:$true] %s73_s7 }
  0x29   :  { %s140_s8 = scalar_lea.vmem %s74_s7, 256  ;;  %p145_p3 = scmp.lt.s32.totalorder %s74_s7, %s74_s7 }
  0x2a   :  { %v43_v4 = vsel %vm42_vm0, %v40_v2, 0.0  ;;  %v46_v5 = vsel %vm42_vm0, %v41_v3, 0.0  ;;  %p141_p2 = scmp.ne.s32.totalorder %s74_s7, %s140_s8  ;;  %p146_p4 = scmp.lt.s32.totalorder %s140_s8, %s140_s8 }
  0x2b   :  { %44 = vadd.xlane.f32.xlu0 %v43_v4 }
  0x2c   :  { %p147_p5 = por %p146_p4, %p145_p3 }
  0x2e   :  { %p148_p6 = pnand %p147_p5, %p141_p2 }
  0x2f   :  { %47 = vadd.xlane.f32.xlu0 %v46_v5 }
  0xb8   :  { %v45_v6 = vpop.xlane.xlu0 %44 }
  0xb9   :  { %v49_v7 = vmul.f32 0.03125, %v45_v6 }
  0xbb   :  { %v51_v8 = vadd.f32 1e-06, %v49_v7 }
  0xbc   :  { %v48_v9 = vpop.xlane.xlu0 %47 }
  0xbd   :  { %92 = vrsqrt.f32 %v51_v8  ;;  %v50_v10 = vmul.f32 0.03125, %v48_v9 }
  0xbf   :  { %v52_v11 = vadd.f32 1e-06, %v50_v10 }
  0xc1   :  { %94 = vrsqrt.f32 %v52_v11 }
  0xc7   :  { %v93_v12 = vpop.eup %92 }
  0xc8   :  { %v55_v14 = vmul.f32 %v93_v12, %v38_v0 }
  0xca   :  { %v64_v15 = vmul.f32 %v86_v13, %v55_v14 }
  0xcb   :  { %v95_v16 = vpop.eup %94 }
  0xcc   :  { %v56_v17 = vmul.f32 %v95_v16, %v39_v1  ;;  %66 = vst.msk [vmem:[#allocation7] sm:$0xff] %vm42_vm0, %v64_v15 }
  0xce   :  { %v65_v18 = vmul.f32 %v86_v13, %v56_v17 }
  0xd0   :  { %67 = vst.msk [vmem:[#allocation7 + $0x8] sm:$0xff] %vm42_vm0, %v65_v18 }
  0xd1   :  { %151 = shalt.err (!%p148_p6)
}
  0xd2   :  { %s152_s11 = scalar_lea.hbm %s236_s2, 256 }
  0xd3   :  { %p153_p7 = scmp.ne.s32.totalorder %s236_s2, %s152_s11  ;;  %p156_p8 = scmp.lt.u32.totalorder %s152_s11, %s236_s2 }
  0xd5   :  { %p158_p9 = pnand %p156_p8, %p153_p7 }
  0xd7   :  { %161 = shalt.err (!%p158_p9)
}
  0xd8   :  { %79 = dma.vmem_to_hbm [thread:$0]  %s74_s7, 256, %s236_s2, [#allocation4], %s169_s19, %s169_s19, %s170_s20  }
  0xd9   :  { %166 = dma.done.wait [#allocation4], 256  }
  0xda   :  { %167 = vsyncadd [#allocation4], 4294967040 }
  0xdb   :  { %83 = vsyncpa [#allocation3], 1 }
  0xdc   :  { %84 = vsyncpa [#allocation6], 1 }
  0xdd   :  { %85 = vsyncpa [#allocation4], 1 }

</bundles_post_ra>
